<compile_context>
chip_gen: v6e
topology: v6e:2x2x1
jax: 0.10.0
libtpu: 0.0.40
codegen_flags: <defaults>
</compile_context>

<pallas_src>
import functools

import jax
import jax.numpy as jnp
from jax import lax
from jax.experimental import pallas as pl
from jax.experimental.pallas import tpu as pltpu

_DEFAULT_IGNORE_INDEX = -100  # torch.nn.CrossEntropyLoss default


def _cdiv(a, b):
    return -(-a // b)


def _ce_kernel(logits_ref, labels_ref, sum_ref, cnt_ref, *,
               ignore_index, batch, block_batch, blocks_per_split):
    # logits_ref: (TB, C) native dtype   labels_ref: (TB, 1) int32
    # sum_ref/cnt_ref: (TB, 1) f32 output blocks, resident across the inner
    # (reduction) grid axis -> used directly as vector accumulators.
    c = pl.program_id(0)   # megacore split (parallel)
    i = pl.program_id(1)   # batch-block within split (arbitrary / reduction)

    @pl.when(i == 0)
    def _init():
        sum_ref[...] = jnp.zeros_like(sum_ref)
        cnt_ref[...] = jnp.zeros_like(cnt_ref)

    logits = logits_ref[...]                 # (TB, C) native dtype
    labels = labels_ref[...]                 # (TB, 1) int32
    tb, n_classes = logits.shape

    # Mask rows by their LOGICAL global index (not by label value): the tail
    # block's overhang and clamped re-read blocks contain unspecified data.
    row0 = (c * blocks_per_split + i) * block_batch
    row_ids = row0 + lax.broadcasted_iota(jnp.int32, (tb, 1), 0)       # (TB, 1)
    valid = jnp.logical_and(row_ids < batch, labels != ignore_index)   # (TB, 1)

    # TODO(synk): on v6e/v7x a bf16 elementwise path (subtract/compare/select in
    # bf16, f32 only for the exp-sum) would relieve the VALU for bf16 inputs.
    x = logits.astype(jnp.float32)                                     # (TB, C)
    m = jnp.max(x, axis=-1, keepdims=True)                             # (TB, 1)
    xm = x - m                                                         # (TB, C)

    # Gather the true-class (shifted) logit with a (1, C) lane iota broadcast
    # against the (TB, 1) labels -- no (TB, C) int32 temporary.
    class_ids = lax.broadcasted_iota(jnp.int32, (1, n_classes), 1)     # (1, C)
    picked_m = jnp.sum(jnp.where(class_ids == labels, xm, 0.0),
                       axis=-1, keepdims=True)                         # (TB, 1)
    lse_m = jnp.log(jnp.sum(jnp.exp(xm), axis=-1, keepdims=True))      # (TB, 1)

    per_example = jnp.where(valid, lse_m - picked_m, 0.0)              # (TB, 1)

    sum_ref[...] += per_example
    cnt_ref[...] += valid.astype(jnp.float32)


def cross_entropy_loss(pred_class, true_class, *,
                       ignore_index=_DEFAULT_IGNORE_INDEX,
                       block_batch=None,
                       target_tile_bytes=2 * 1024 * 1024,
                       n_split=2):
    """pred_class: [B, C] float (f32 or bf16), true_class: [B] integer class ids.

    Returns {'loss': scalar float32} with nn.CrossEntropyLoss() semantics
    (mean reduction over non-ignored targets, ignore_index=-100).
    """
    batch, n_classes = pred_class.shape
    itemsize = jnp.dtype(pred_class.dtype).itemsize
    # Sublane packing: 8 rows for 32-bit, 16 for bf16, 32 for 8-bit dtypes.
    packing = 8 * max(1, 4 // itemsize)

    if block_batch is None:
        if batch <= packing:
            block_batch = batch                     # single full-extent block
        else:
            rows_budget = max(packing,
                              target_tile_bytes // max(1, n_classes * itemsize))
            rows_budget = (rows_budget // packing) * packing
            rows_cap = (batch // packing) * packing  # keep block <= array rows
            block_batch = max(packing, min(rows_budget, rows_cap))
    block_batch = int(block_batch)

    # Guard vocab-scale C: even the minimum tile would blow VMEM.
    # TODO(synk): add a second grid axis over classes with an online
    # (flash-style) max/exp-sum for vocab-scale C instead of raising.
    f32_tile_bytes = block_batch * n_classes * 4
    if f32_tile_bytes > 6 * 1024 * 1024:
        raise NotImplementedError(
            f"class dim {n_classes} too large for a whole-row tile "
            f"({f32_tile_bytes} working bytes); class-split CE not implemented")

    total_blocks = _cdiv(batch, block_batch)
    n_split = max(1, min(int(n_split), total_blocks))
    blocks_per_split = _cdiv(total_blocks, n_split)

    # Labels are tiny; pad them (with ignore_index) so every grid step has a
    # fully in-bounds label block. Logits are NOT padded.
    labels = true_class.astype(jnp.int32)
    padded_batch = n_split * blocks_per_split * block_batch
    if padded_batch > batch:
        labels = jnp.pad(labels, (0, padded_batch - batch),
                         constant_values=ignore_index)
    labels2d = labels.reshape(padded_batch, 1)

    def logits_map(c, i):
        # Clamp so a fully-out-of-range logical block re-reads the last real
        # block (its rows are masked in-kernel by global row index anyway).
        return (jnp.minimum(c * blocks_per_split + i, total_blocks - 1), 0)

    def labels_map(c, i):
        return (c * blocks_per_split + i, 0)

    def out_map(c, i):
        return (c, 0)   # one resident accumulator block per megacore split

    kernel = functools.partial(
        _ce_kernel, ignore_index=ignore_index, batch=batch,
        block_batch=block_batch, blocks_per_split=blocks_per_split)

    out_sum, out_cnt = pl.pallas_call(
        kernel,
        out_shape=(
            jax.ShapeDtypeStruct((n_split * block_batch, 1), jnp.float32),
            jax.ShapeDtypeStruct((n_split * block_batch, 1), jnp.float32),
        ),
        grid=(n_split, blocks_per_split),
        in_specs=[
            pl.BlockSpec((block_batch, n_classes), logits_map),
            pl.BlockSpec((block_batch, 1), labels_map),
        ],
        out_specs=(
            pl.BlockSpec((block_batch, 1), out_map),
            pl.BlockSpec((block_batch, 1), out_map),
        ),
        compiler_params=pltpu.CompilerParams(
            dimension_semantics=("parallel", "arbitrary"),
            vmem_limit_bytes=40 * 1024 * 1024,
        ),
    )(pred_class, labels2d)

    # Tiny final reduction + divide in the wrapper (2 * TB elements).
    total = jnp.sum(out_sum)
    count = jnp.sum(out_cnt)
    return {'loss': total / count}


def _reference_loss(pred_class, true_class, ignore_index=_DEFAULT_IGNORE_INDEX):
    logp = jax.nn.log_softmax(pred_class.astype(jnp.float32), axis=-1)
    labels = true_class.astype(jnp.int32)
    valid = labels != ignore_index
    safe = jnp.where(valid, labels, 0)
    nll = -jnp.take_along_axis(logp, safe[:, None], axis=-1)[:, 0]
    return jnp.sum(jnp.where(valid, nll, 0.0)) / jnp.sum(valid.astype(jnp.float32))


if __name__ == "__main__":
    key = jax.random.PRNGKey(0)
    k_logits, k_labels = jax.random.split(key)

    B, C = 20, 40
    pred_class = jax.random.normal(k_logits, (B, C), dtype=jnp.float32)
    true_class = jax.random.randint(k_labels, (B,), 0, C, dtype=jnp.int32)
    # Exercise PyTorch's default ignore_index=-100 handling.
    true_class = true_class.at[3].set(-100)

    ref = jax.block_until_ready(_reference_loss(pred_class, true_class))

    # Default tiling: block_batch=16 -> 2 blocks, one per megacore split;
    # exercises the unpadded ragged tail (rows 20..31 masked in-kernel).
    loss1 = jax.block_until_ready(cross_entropy_loss(pred_class, true_class)['loss'])
    assert jnp.allclose(loss1, ref, atol=1e-5, rtol=1e-5), (loss1, ref)

    # Small forced tile: multi-step accumulation per split + clamped tail block.
    loss2 = jax.block_until_ready(
        cross_entropy_loss(pred_class, true_class, block_batch=8)['loss'])
    assert jnp.allclose(loss2, ref, atol=1e-5, rtol=1e-5), (loss2, ref)

    print("KERNEL_OK")
</pallas_src>

<mosaic_0001>
module attributes {stable_mosaic.version = 11 : i64} {
  func.func @_ce_kernel(%arg0: i32, %arg1: i32, %arg2: memref<16x40xf32, #tpu.memory_space<vmem>>, %arg3: memref<16x1xi32, #tpu.memory_space<vmem>>, %arg4: memref<16x1xf32, #tpu.memory_space<vmem>>, %arg5: memref<16x1xf32, #tpu.memory_space<vmem>>) attributes {dimension_semantics = [#tpu.dimension_semantics<parallel>, #tpu.dimension_semantics<arbitrary>], iteration_bounds = array<i64: 2, 1>, scalar_prefetch = 0 : i64, scratch_operands = 0 : i64, tpu.core_type = #tpu.core_type<tc>, window_params = [{transform_indices = @transform_0, window_bounds = array<i64: 16, 40>}, {transform_indices = @transform_1, window_bounds = array<i64: 16, 1>}, {transform_indices = @transform_2, window_bounds = array<i64: 16, 1>}, {transform_indices = @transform_3, window_bounds = array<i64: 16, 1>}]} {
    %c0_i32 = arith.constant 0 : i32
    %0 = arith.cmpi eq, %arg1, %c0_i32 : i32
    %1 = arith.extui %0 : i1 to i32
    %c0_i32_0 = arith.constant 0 : i32
    %2 = arith.cmpi ne, %1, %c0_i32_0 : i32
    scf.if %2 {
      %cst_16 = arith.constant 0.000000e+00 : f32
      %43 = vector.broadcast %cst_16 : f32 to vector<16x1xf32>
      %c0_17 = arith.constant 0 : index
      %c0_18 = arith.constant 0 : index
      %44 = vector.load %arg4[%c0_17, %c0_18] : memref<16x1xf32, #tpu.memory_space<vmem>>, vector<16x1xf32>
      tpu.vector_store %arg4[%c0_17, %c0_18], %43 {strides = array<i32>} : memref<16x1xf32, #tpu.memory_space<vmem>>, vector<16x1xf32>,
      %cst_19 = arith.constant 0.000000e+00 : f32
      %45 = vector.broadcast %cst_19 : f32 to vector<16x1xf32>
      %c0_20 = arith.constant 0 : index
      %c0_21 = arith.constant 0 : index
      %46 = vector.load %arg5[%c0_20, %c0_21] : memref<16x1xf32, #tpu.memory_space<vmem>>, vector<16x1xf32>
      tpu.vector_store %arg5[%c0_20, %c0_21], %45 {strides = array<i32>} : memref<16x1xf32, #tpu.memory_space<vmem>>, vector<16x1xf32>,
    } else {
    }
    %c0 = arith.constant 0 : index
    %c0_1 = arith.constant 0 : index
    %3 = vector.load %arg2[%c0, %c0_1] : memref<16x40xf32, #tpu.memory_space<vmem>>, vector<16x40xf32>
    %c0_2 = arith.constant 0 : index
    %c0_3 = arith.constant 0 : index
    %4 = vector.load %arg3[%c0_2, %c0_3] : memref<16x1xi32, #tpu.memory_space<vmem>>, vector<16x1xi32>
    %c1_i32 = arith.constant 1 : i32
    %5 = arith.muli %arg0, %c1_i32 : i32
    %6 = arith.addi %5, %arg1 : i32
    %c16_i32 = arith.constant 16 : i32
    %7 = arith.muli %6, %c16_i32 : i32
    %8 = tpu.iota {dimensions = array<i32: 0>} : vector<16x1xi32>
    %9 = vector.broadcast %7 : i32 to vector<16x1xi32>
    %10 = arith.addi %9, %8 : vector<16x1xi32>
    %c20_i32 = arith.constant 20 : i32
    %11 = vector.broadcast %c20_i32 : i32 to vector<16x1xi32>
    %12 = arith.cmpi slt, %10, %11 : vector<16x1xi32>
    %c-100_i32 = arith.constant -100 : i32
    %13 = vector.broadcast %c-100_i32 : i32 to vector<16x1xi32>
    %14 = arith.cmpi ne, %4, %13 : vector<16x1xi32>
    %15 = arith.andi %12, %14 : vector<16x1xi1>
    %cst = arith.constant dense<0xFF800000> : vector<16xf32>
    %16 = vector.multi_reduction <maximumf>, %3, %cst [1] : vector<16x40xf32> to vector<16xf32>
    %17 = vector.shape_cast %16 : vector<16xf32> to vector<16x1xf32>
    %18 = vector.broadcast %17 : vector<16x1xf32> to vector<16x40xf32>
    %19 = arith.subf %3, %18 : vector<16x40xf32>
    %20 = tpu.iota {dimensions = array<i32: 1>} : vector<1x40xi32>
    %21 = vector.broadcast %20 : vector<1x40xi32> to vector<16x40xi32>
    %22 = vector.broadcast %4 : vector<16x1xi32> to vector<16x40xi32>
    %23 = arith.cmpi eq, %21, %22 : vector<16x40xi32>
    %cst_4 = arith.constant 0.000000e+00 : f32
    %24 = vector.broadcast %cst_4 : f32 to vector<16x40xf32>
    %25 = arith.select %23, %19, %24 : vector<16x40xi1>, vector<16x40xf32>
    %cst_5 = arith.constant dense<0.000000e+00> : vector<16xf32>
    %26 = vector.multi_reduction <add>, %25, %cst_5 [1] : vector<16x40xf32> to vector<16xf32>
    %27 = vector.shape_cast %26 : vector<16xf32> to vector<16x1xf32>
    %28 = math.exp %19 : vector<16x40xf32>
    %cst_6 = arith.constant dense<0.000000e+00> : vector<16xf32>
    %29 = vector.multi_reduction <add>, %28, %cst_6 [1] : vector<16x40xf32> to vector<16xf32>
    %30 = vector.shape_cast %29 : vector<16xf32> to vector<16x1xf32>
    %31 = math.log %30 : vector<16x1xf32>
    %32 = arith.subf %31, %27 : vector<16x1xf32>
    %cst_7 = arith.constant 0.000000e+00 : f32
    %33 = vector.broadcast %cst_7 : f32 to vector<16x1xf32>
    %34 = arith.select %15, %32, %33 : vector<16x1xi1>, vector<16x1xf32>
    %c0_8 = arith.constant 0 : index
    %c0_9 = arith.constant 0 : index
    %35 = vector.load %arg4[%c0_8, %c0_9] : memref<16x1xf32, #tpu.memory_space<vmem>>, vector<16x1xf32>
    %36 = arith.addf %35, %34 : vector<16x1xf32>
    %c0_10 = arith.constant 0 : index
    %c0_11 = arith.constant 0 : index
    %37 = vector.load %arg4[%c0_10, %c0_11] : memref<16x1xf32, #tpu.memory_space<vmem>>, vector<16x1xf32>
    tpu.vector_store %arg4[%c0_10, %c0_11], %36 {strides = array<i32>} : memref<16x1xf32, #tpu.memory_space<vmem>>, vector<16x1xf32>,
    %c0_12 = arith.constant 0 : index
    %c0_13 = arith.constant 0 : index
    %38 = vector.load %arg5[%c0_12, %c0_13] : memref<16x1xf32, #tpu.memory_space<vmem>>, vector<16x1xf32>
    %39 = arith.extui %15 : vector<16x1xi1> to vector<16x1xi32>
    %40 = arith.sitofp %39 : vector<16x1xi32> to vector<16x1xf32>
    %41 = arith.addf %38, %40 : vector<16x1xf32>
    %c0_14 = arith.constant 0 : index
    %c0_15 = arith.constant 0 : index
    %42 = vector.load %arg5[%c0_14, %c0_15] : memref<16x1xf32, #tpu.memory_space<vmem>>, vector<16x1xf32>
    tpu.vector_store %arg5[%c0_14, %c0_15], %41 {strides = array<i32>} : memref<16x1xf32, #tpu.memory_space<vmem>>, vector<16x1xf32>,
    return
  }
  func.func @transform_0(%arg0: i32, %arg1: i32) -> (i32, i32) {
    %c1_i32 = arith.constant 1 : i32
    %0 = arith.muli %arg0, %c1_i32 : i32
    %1 = arith.addi %0, %arg1 : i32
    %c1_i32_0 = arith.constant 1 : i32
    %2 = arith.minsi %1, %c1_i32_0 : i32
    %c0_i32 = arith.constant 0 : i32
    %c0_i32_1 = arith.constant 0 : i32
    return %2, %c0_i32 : i32, i32
  }
  func.func @transform_1(%arg0: i32, %arg1: i32) -> (i32, i32) {
    %c1_i32 = arith.constant 1 : i32
    %0 = arith.muli %arg0, %c1_i32 : i32
    %1 = arith.addi %0, %arg1 : i32
    %c0_i32 = arith.constant 0 : i32
    %c0_i32_0 = arith.constant 0 : i32
    return %1, %c0_i32 : i32, i32
  }
  func.func @transform_2(%arg0: i32, %arg1: i32) -> (i32, i32) {
    %c0_i32 = arith.constant 0 : i32
    %c0_i32_0 = arith.constant 0 : i32
    return %arg0, %c0_i32 : i32, i32
  }
  func.func @transform_3(%arg0: i32, %arg1: i32) -> (i32, i32) {
    %c0_i32 = arith.constant 0 : i32
    %c0_i32_0 = arith.constant 0 : i32
    return %arg0, %c0_i32 : i32, i32
  }
}

</mosaic_0001>

<bundles_post_ra>
// kernel: tpu_custom_call.1
= control target key start
LH: loop header
LB: loop body
LE: loop exit
PB: predicated region body
PF: predicated region fallthrough
CT: control target
= control target key end

     0   :  { %s570_s12 = smov 0   ;;  %s572_s13 = smov 0   ;;  %s661_s0 = inlined_call_operand.vmem [shape: f32[20,40], index: 0, kind: input, shape index: {}]   ;;  %s662_s1 = inlined_call_operand.vmem [shape: s32[32,1], index: 1, kind: input, shape index: {}]   ;;  %s663_s2 = inlined_call_operand.vmem [shape: f32[32,1], index: 2, kind: output, shape index: {0}]   ;;  %s664_s3 = inlined_call_operand.vmem [shape: f32[32,1], index: 3, kind: output, shape index: {1}]  }
   0x1   :  { %s574_s14 = smov 0  }
   0x2 LB: > { %s26_s15 = sadd.s32 1, %s542_s13  ;;  %p474_p0 = scmp.ge.s32.totalorder %s546_s14, 1  ;;  %s546_s14 = sphi %s574_s14, %s14_s14   ;;  %s542_s13 = sphi %s572_s13, %s670_s13   ;;  %s538_s12 = sphi %s570_s12, %s669_s12  }
   0x3   : > { %p28_p1 = scmp.ge.s32.totalorder %s26_s15, 2  ;;  %p188_p2 = scmp.lt.s32.totalorder %s546_s14, 3 }
   0x5   : > { %s672_s15 = smov (%p28_p1, %s26_s15), 0  ;;  %p189_p3 = pnand %p474_p0, %p188_p2 }
   0x6   : > { %p231_p4 = scmp.lt.s32.totalorder (!%p189_p3), %s538_s12, 1  ;;  %s477_s16 = sshll.u32 (!%p189_p3), %s538_s12, 1 }
   0x7   : > { %192 = sbr.rel (%p189_p3) target bundleno = 343 (0x157), region = 28  ;;  %p252_p5 = scmp.lt.s32.totalorder (!%p189_p3), %s477_s16, 3 }
   0x8   : > { %s483_s6 = sshll.u32 (!%p189_p3), %s538_s12, 4 }
   0xc   : > { %v548_v0 = vmov 0   ;;  %s232_s17 = scalar_select %p231_p4, %s538_s12, 1  ;;  %vm274_vm0 = vcmask 7168   ;;  %v549_v1 = vmov 0.0   ;;  %vm297_vm1 = vcmask 326656  }
   0xd   : > { %514 = vset.pattern.permute.xlu1 %v548_v0  ;;  %515 = vset.pattern.permute.xlu0 %v548_v0  ;;  %s674_s16 = smov (!%p252_p5, %s477_s16), 3  ;;  %v285_v14 = vlaneseq  ;;  %v288_v27 = vstv %s483_s6 }
   0xe   : > { %s475_s18 = sshll.u32 %s232_s17, 1  ;;  %s478_s19 = sshll.u32 %s674_s16, 3 }
   0xf   : > { %p238_p6 = scmp.lt.s32.totalorder %s475_s18, 2  ;;  %s255_s22 = scalar_lea.vmem %s662_s1, %s478_s19  ;;  %v307_v16 = vand.u32 127, %v285_v14  ;;  %v286_v26 = vshrl.u32 %v285_v14, 7 }
  0x10   : > { %s599_s25 = scalar_lea.vmem %s663_s2, %s478_s19  ;;  %v281_v2 = vld [vmem:[%s255_s22] sm:$0xff]  ;;  %s606_s28 = scalar_lea.vmem %s664_s3, %s478_s19  ;;  %v282_v3 = vld [vmem:[%s255_s22 + $0x8] sm:$0xff] }
  0x11   : > { %s676_s18 = smov (!%p238_p6, %s475_s18), 2  ;;  %275 = vst.msk [vmem:[%s599_s25] sm:$0xff] %vm274_vm0, %v549_v1  ;;  %276 = vst.msk [vmem:[%s599_s25 + $0x8] sm:$0xff] %vm274_vm0, %v549_v1  ;;  %309 = vperm.xlu1 %514, %v281_v2   ;;  %v289_v28 = vadd.s32 %v288_v27, %v286_v26  ;;  %vm293_vm5 = vcmp.ne.s32.totalorder %v281_v2, 4294967196  ;;  %v287_v32 = vadd.s32 8, %v286_v26  ;;  %vm294_vm7 = vcmp.ne.s32.totalorder %v282_v3, 4294967196 }
  0x12   : > { %s476_s29 = sshll.u32 %s676_s18, 3  ;;  %277 = vst.msk [vmem:[%s606_s28] sm:$0xff] %vm274_vm0, %v549_v1  ;;  %278 = vst.msk [vmem:[%s606_s28 + $0x8] sm:$0xff] %vm274_vm0, %v549_v1 }
  0x13   : > { %s241_s5 = scalar_lea.vmem %s661_s0, %s476_s29  ;;  %vm291_vm4 = vcmp.lt.s32.totalorder %v289_v28, 20  ;;  %v290_v34 = vadd.s32 %v288_v27, %v287_v32 }
  0x14   : > { %v279_v4 = vld [vmem:[%s241_s5] sm:$0xff]  ;;  %v280_v5 = vld [vmem:[%s241_s5 + $0x8] sm:$0xff]  ;;  %vm624_vm6 = vmand %vm291_vm4, %vm293_vm5 }
  0x15   : > { %v298_v6 = vsel %vm297_vm1, %v279_v4, -inf  ;;  %312 = vperm.xlu1 %514, %v282_v3   ;;  %v301_v7 = vsel %vm297_vm1, %v280_v5, -inf  ;;  %v484_v31 = vsel %vm624_vm6, 1.0, %v549_v1  ;;  %vm292_vm8 = vcmp.lt.s32.totalorder %v290_v34, 20 }
  0x16   : > { %299 = vmax.xlane.f32.xlu0 %v298_v6  ;;  %vm631_vm9 = vmand %vm292_vm8, %vm294_vm7 }
  0x17   : > { %v485_v37 = vsel %vm631_vm9, 1.0, %v549_v1 }
  0x18   : > { %v342_v44 = vld [vmem:[%s599_s25] sm:$0xff]  ;;  %v343_v49 = vld [vmem:[%s599_s25 + $0x8] sm:$0xff] }
  0x19   : > { %v349_v30 = vld [vmem:[%s606_s28] sm:$0xff]  ;;  %v350_v36 = vld [vmem:[%s606_s28 + $0x8] sm:$0xff] }
  0x1a   : > { %302 = vmax.xlane.f32.xlu0 %v301_v7  ;;  %v355_v33 = vadd.f32 %v484_v31, %v349_v30  ;;  %v356_v38 = vadd.f32 %v485_v37, %v350_v36 }
  0x1c   : > { %357 = vst.msk [vmem:[%s606_s28] sm:$0xff] %vm274_vm0, %v355_v33  ;;  %358 = vst.msk [vmem:[%s606_s28 + $0x8] sm:$0xff] %vm274_vm0, %v356_v38 }
  0x8c   : > { %v310_v15 = vpop.permute.xlu1 %309 }
  0x8d   : > { %vm314_vm2 = vcmp.eq.s32.totalorder %v307_v16, %v310_v15 }
  0x90   : > { %v313_v18 = vpop.permute.xlu1 %312 }
  0x91   : > { %vm315_vm3 = vcmp.eq.s32.totalorder %v307_v16, %v313_v18 }
  0x9f   : > { %v300_v8 = vpop.xlane.xlu0 %299 }
  0xa0   : > { %v304_v9 = vsub.f32 %v279_v4, %v300_v8 }
  0xa2   : > { %v324_v10 = vmul.f32 1.442695, %v304_v9  ;;  %v316_v20 = vsel %vm314_vm2, %v304_v9, 0.0 }
  0xa3   : > { %v303_v11 = vpop.xlane.xlu0 %302  ;;  %v318_v22 = vsel %vm297_vm1, %v316_v20, 0.0 }
  0xa4   : > { %516 = vpow2.f32 %v324_v10  ;;  %v305_v12 = vsub.f32 %v280_v5, %v303_v11 }
  0xa6   : > { %v326_v13 = vmul.f32 1.442695, %v305_v12  ;;  %v317_v24 = vsel %vm315_vm3, %v305_v12, 0.0 }
  0xa7   : > { %v321_v25 = vsel %vm297_vm1, %v317_v24, 0.0 }
  0xa8   : > { %518 = vpow2.f32 %v326_v13 }
  0xb1   : > { %v517_v17 = vpop.eup %516 }
  0xb2   : > { %v328_v19 = vsel %vm297_vm1, %v517_v17, 0.0 }
  0xb3   : > { %329 = vadd.xlane.f32.xlu0 %v328_v19 }
  0xb5   : > { %v519_v21 = vpop.eup %518 }
  0xb6   : > { %v331_v23 = vsel %vm297_vm1, %v519_v21, 0.0 }
  0xb7   : > { %319 = vadd.xlane.f32.xlu0 %v318_v22  ;;  %332 = vadd.xlane.f32.xlu1 %v331_v23 }
  0xbb   : > { %322 = vadd.xlane.f32.xlu0 %v321_v25 }
 0x13c   : > { %v330_v39 = vpop.xlane.xlu0 %329 }
 0x13d   : > { %520 = vlog2.f32 %v330_v39 }
 0x140   : > { %v333_v40 = vpop.xlane.xlu1 %332  ;;  %v320_v42 = vpop.xlane.xlu0 %319 }
 0x141   : > { %522 = vlog2.f32 %v333_v40 }
 0x144   : > { %v323_v51 = vpop.xlane.xlu0 %322 }
 0x14a   : > { %v521_v41 = vpop.eup %520 }
 0x14b   : > { %v335_v43 = vmul.f32 0.6931472, %v521_v41 }
 0x14d   : > { %v338_v45 = vsub.f32 %v335_v43, %v320_v42 }
 0x14e   : > { %v523_v46 = vpop.eup %522 }
 0x14f   : > { %v340_v47 = vsel %vm624_vm6, %v338_v45, 0.0  ;;  %v337_v48 = vmul.f32 0.6931472, %v523_v46 }
 0x150   : > { %v344_v50 = vadd.f32 %v342_v44, %v340_v47 }
 0x151   : > { %v339_v52 = vsub.f32 %v337_v48, %v323_v51 }
 0x152   : > { %347 = vst.msk [vmem:[%s599_s25] sm:$0xff] %vm274_vm0, %v344_v50 }
 0x153   : > { %v341_v53 = vsel %vm631_vm9, %v339_v52, 0.0 }
 0x154   : > { %v345_v54 = vadd.f32 %v343_v49, %v341_v53 }
 0x156   : > { %348 = vst.msk [vmem:[%s599_s25 + $0x8] sm:$0xff] %vm274_vm0, %v345_v54 }
 0x157 PF: > { %s14_s14 = sadd.s32 1, %s546_s14   ;;  %s669_s12 = smov %s542_s13 }
 0x158   : > { %p11_p7 = scmp.ge.s32.totalorder %s14_s14, 4   ;;  %s670_s13 = smov %s672_s15 }
 0x15a   :  { %13 = sbr.rel (!%p11_p7) target bundleno = 2 (0x2), region = 77 }

</bundles_post_ra>
